<compile_context>
chip_gen: v7x
topology: tpu7x:2x2x1
jax: 0.10.0
libtpu: 0.0.40
codegen_flags: <defaults>
</compile_context>

<pallas_src>
import jax
import jax.numpy as jnp
from jax.experimental import pallas as pl
from jax.experimental.pallas import tpu as pltpu


# ---------------------------------------------------------------------------
# Variant A: batched concat kernel  (prefix | ctx | suffix) -> prompts block
# ---------------------------------------------------------------------------
def _prompt_concat_kernel(prefix_ref, ctx_ref, suffix_ref, out_ref):
    # prefix_ref: (Cb, 1, D), ctx_ref: (1, n_ctx, D),
    # suffix_ref: (Cb, suffix_len, D), out_ref: (Cb, L, D)
    cb = out_ref.shape[0]
    n_ctx, d = ctx_ref.shape[1], ctx_ref.shape[2]
    # Broadcast shared ctx along the (cheap) leading class axis, assemble the
    # full tile in registers, and do ONE unmasked full-block store (no
    # sublane-offset masked stores on the single vst slot).
    ctx_block = jnp.broadcast_to(ctx_ref[...], (cb, n_ctx, d))
    out_ref[...] = jnp.concatenate(
        [prefix_ref[...], ctx_block, suffix_ref[...]], axis=1)


def prompt_learner_forward(ctx, token_prefix, token_suffix, tokenized_prompts,
                           *,
                           block_budget_bytes=20 * 1024 * 1024,
                           vmem_limit_bytes=32 * 1024 * 1024):
    """
    ctx:               (1, n_ctx, ctx_dim)            learned context vectors
    token_prefix:      (n_cls, 1, ctx_dim)            SOS embedding per class
    token_suffix:      (n_cls, suffix_len, ctx_dim)   class-name + EOS embeddings
    tokenized_prompts: (n_cls, L) int32

    Returns (prompts, tokenized_prompts) matching PromptLearner.forward
    (prompt_pos == 2 branch).
    """
    n_cls, _, ctx_dim = token_prefix.shape
    _, n_ctx, _ = ctx.shape
    suffix_len = token_suffix.shape[1]
    L = 1 + n_ctx + suffix_len
    dtype = token_prefix.dtype
    itemsize = jnp.dtype(dtype).itemsize

    # Classes per grid step: big DMAs amortize the ~0.35us per-step overhead.
    # Budget: double-buffered (prefix + suffix + out) blocks stay under
    # block_budget_bytes; ctx is tiny and fetched once.
    per_class_bytes = 2 * (1 + suffix_len + L) * ctx_dim * itemsize
    cb = int(max(1, min(n_cls, block_budget_bytes // per_class_bytes)))

    prompts = pl.pallas_call(
        _prompt_concat_kernel,
        out_shape=jax.ShapeDtypeStruct((n_cls, L, ctx_dim), dtype),
        grid_spec=pltpu.PrefetchScalarGridSpec(
            num_scalar_prefetch=0,
            grid=(pl.cdiv(n_cls, cb),),
            in_specs=[
                # per-class prefix rows
                pl.BlockSpec((cb, 1, ctx_dim), lambda i: (i, 0, 0)),
                # shared ctx: constant block index -> fetched once, stays resident
                pl.BlockSpec((1, n_ctx, ctx_dim), lambda i: (0, 0, 0)),
                # per-class suffix rows
                pl.BlockSpec((cb, suffix_len, ctx_dim), lambda i: (i, 0, 0)),
            ],
            out_specs=pl.BlockSpec((cb, L, ctx_dim), lambda i: (i, 0, 0)),
        ),
        compiler_params=pltpu.CompilerParams(
            dimension_semantics=("parallel",),   # class blocks split across TCs (v7x)
            vmem_limit_bytes=vmem_limit_bytes,
        ),
    )(token_prefix, ctx.astype(dtype), token_suffix)

    # tokenized_prompts.view(n_cls, -1): pure reshape glue.
    return prompts, tokenized_prompts.reshape(n_cls, -1)


# ---------------------------------------------------------------------------
# Variant B: in-place ctx scatter into the full token embedding (aliased HBM)
# Only the n_ctx*D bytes per class that actually change are moved.
# ---------------------------------------------------------------------------
def _ctx_scatter_kernel(ctx_ref, emb_ref, out_ref, ctx_rep_ref, sem):
    # ctx_ref:     (1, n_ctx, D) in VMEM
    # emb_ref:     (n_cls, L, D) in HBM, aliased to out_ref (prefix/suffix rows
    #              already hold the right data; we never read or copy them)
    # out_ref:     (n_cls, L, D) in HBM (same buffer as emb_ref)
    # ctx_rep_ref: (n_cls, n_ctx, D) VMEM scratch
    # sem:         DMA semaphore
    del emb_ref
    n_cls, n_ctx, d = ctx_rep_ref.shape
    ctx_rep_ref[...] = jnp.broadcast_to(ctx_ref[...], (n_cls, n_ctx, d))
    # One strided DMA: VMEM (n_cls, n_ctx, D) -> HBM rows 1 .. 1+n_ctx of every
    # class (stride L*D between classes). Prefix/suffix rows are untouched.
    cp = pltpu.make_async_copy(
        ctx_rep_ref, out_ref.at[:, pl.ds(1, n_ctx), :], sem)
    cp.start()
    cp.wait()


def prompt_learner_forward_inplace(ctx, embedding, tokenized_prompts):
    """
    ctx:       (1, n_ctx, ctx_dim)
    embedding: (n_cls, L, ctx_dim)  full token embedding of the tokenized
               prompts (what __init__ computes); rows 1..1+n_ctx are the
               placeholder 'x' tokens and are the only rows overwritten.
    Output is the embedding buffer with ctx written into rows 1..1+n_ctx,
    identical to the concat result, at ~1/(2L/n_ctx) of the HBM traffic.
    """
    n_cls, L, ctx_dim = embedding.shape
    _, n_ctx, _ = ctx.shape
    dtype = embedding.dtype
    # TODO(synk): for very large n_cls chunk the (n_cls, n_ctx, D) scratch /
    # DMA over a class-block grid to bound VMEM usage.

    prompts = pl.pallas_call(
        _ctx_scatter_kernel,
        out_shape=jax.ShapeDtypeStruct((n_cls, L, ctx_dim), dtype),
        grid=(1,),
        in_specs=[
            pl.BlockSpec((1, n_ctx, ctx_dim), lambda i: (0, 0, 0)),  # ctx -> VMEM
            pl.BlockSpec(memory_space=pl.ANY),                        # embedding stays in HBM
        ],
        out_specs=pl.BlockSpec(memory_space=pl.ANY),                  # aliased HBM output
        scratch_shapes=[
            pltpu.VMEM((n_cls, n_ctx, ctx_dim), dtype),
            pltpu.SemaphoreType.DMA,
        ],
        input_output_aliases={1: 0},   # embedding (input 1) aliases output 0
        compiler_params=pltpu.CompilerParams(has_side_effects=True),
    )(ctx.astype(dtype), embedding)

    return prompts, tokenized_prompts.reshape(n_cls, -1)


if __name__ == "__main__":
    # Small deterministic setup consistent with the module's __init__.
    n_cls = 4          # number of class names
    n_ctx = 8          # learned context tokens
    ctx_dim = 128      # CLIP ln_final width (small, lane-aligned)
    seq_len = 16       # 1 + n_ctx + suffix_len
    suffix_len = seq_len - 1 - n_ctx
    dtype = jnp.float32

    key = jax.random.PRNGKey(0)
    k_ctx, k_emb, k_tok = jax.random.split(key, 3)

    # ctx ~ Normal(0, 0.02), shape (1, n_ctx, ctx_dim) -- matches nn.init.normal_
    ctx = (0.02 * jax.random.normal(k_ctx, (1, n_ctx, ctx_dim))).astype(dtype)

    # Synthetic token embeddings (stand-in for clip_model.token_embedding(...)).
    embedding = jax.random.normal(k_emb, (n_cls, seq_len, ctx_dim)).astype(dtype)
    token_prefix = embedding[:, :1, :]              # (n_cls, 1, ctx_dim)
    token_suffix = embedding[:, 1 + n_ctx:, :]      # (n_cls, suffix_len, ctx_dim)

    # Synthetic tokenized prompts (stand-in for clip tokenize()).
    tokenized_prompts = jax.random.randint(
        k_tok, (n_cls, seq_len), 0, 49408, dtype=jnp.int32)

    # Pure-JAX reference (mirrors torch.cat(dim=2) + view).
    ref = jnp.concatenate(
        [token_prefix,
         jnp.broadcast_to(ctx, (n_cls, n_ctx, ctx_dim)),
         token_suffix], axis=1)

    # --- Variant A: batched concat kernel --------------------------------
    prompts_a, tok_a = prompt_learner_forward(
        ctx, token_prefix, token_suffix, tokenized_prompts)
    prompts_a = jax.block_until_ready(prompts_a)
    tok_a = jax.block_until_ready(tok_a)
    assert prompts_a.shape == (n_cls, seq_len, ctx_dim), prompts_a.shape
    assert tok_a.shape == (n_cls, seq_len), tok_a.shape
    assert jnp.allclose(prompts_a, ref), "variant A mismatch vs reference concat"

    # --- Variant B: aliased in-place ctx scatter --------------------------
    prompts_b, tok_b = prompt_learner_forward_inplace(
        ctx, embedding, tokenized_prompts)
    prompts_b = jax.block_until_ready(prompts_b)
    tok_b = jax.block_until_ready(tok_b)
    assert prompts_b.shape == (n_cls, seq_len, ctx_dim), prompts_b.shape
    assert tok_b.shape == (n_cls, seq_len), tok_b.shape
    assert jnp.allclose(prompts_b, ref), "variant B mismatch vs reference concat"

    print("KERNEL_OK")
</pallas_src>

<mosaic_0001>
module attributes {stable_mosaic.version = 11 : i64} {
  func.func @_prompt_concat_kernel(%arg0: i32, %arg1: memref<4x1x128xf32, #tpu.memory_space<vmem>>, %arg2: memref<1x8x128xf32, #tpu.memory_space<vmem>>, %arg3: memref<4x7x128xf32, #tpu.memory_space<vmem>>, %arg4: memref<4x16x128xf32, #tpu.memory_space<vmem>>) attributes {dimension_semantics = [#tpu.dimension_semantics<parallel>], iteration_bounds = array<i64: 1>, scalar_prefetch = 0 : i64, scratch_operands = 0 : i64, tpu.core_type = #tpu.core_type<tc>, window_params = [{transform_indices = @transform_0, window_bounds = array<i64: 4, 1, 128>}, {pipeline_mode = #tpu.pipeline_mode<synchronous>, transform_indices = @transform_1, window_bounds = array<i64: 1, 8, 128>}, {transform_indices = @transform_2, window_bounds = array<i64: 4, 7, 128>}, {transform_indices = @transform_3, window_bounds = array<i64: 4, 16, 128>}]} {
    %c0 = arith.constant 0 : index
    %c0_0 = arith.constant 0 : index
    %c0_1 = arith.constant 0 : index
    %0 = vector.load %arg2[%c0, %c0_0, %c0_1] : memref<1x8x128xf32, #tpu.memory_space<vmem>>, vector<1x8x128xf32>
    %1 = vector.shape_cast %0 : vector<1x8x128xf32> to vector<1x8x128xf32>
    %2 = vector.broadcast %1 : vector<1x8x128xf32> to vector<4x8x128xf32>
    %c0_2 = arith.constant 0 : index
    %c0_3 = arith.constant 0 : index
    %c0_4 = arith.constant 0 : index
    %3 = vector.load %arg1[%c0_2, %c0_3, %c0_4] : memref<4x1x128xf32, #tpu.memory_space<vmem>>, vector<4x1x128xf32>
    %c0_5 = arith.constant 0 : index
    %c0_6 = arith.constant 0 : index
    %c0_7 = arith.constant 0 : index
    %4 = vector.load %arg3[%c0_5, %c0_6, %c0_7] : memref<4x7x128xf32, #tpu.memory_space<vmem>>, vector<4x7x128xf32>
    %5 = tpu.concatenate %3, %2, %4 in 1 : vector<4x1x128xf32>, vector<4x8x128xf32>, vector<4x7x128xf32> -> vector<4x16x128xf32>
    %c0_8 = arith.constant 0 : index
    %c0_9 = arith.constant 0 : index
    %c0_10 = arith.constant 0 : index
    %6 = vector.load %arg4[%c0_8, %c0_9, %c0_10] : memref<4x16x128xf32, #tpu.memory_space<vmem>>, vector<4x16x128xf32>
    tpu.vector_store %arg4[%c0_8, %c0_9, %c0_10], %5 {strides = array<i32>} : memref<4x16x128xf32, #tpu.memory_space<vmem>>, vector<4x16x128xf32>,
    return
  }
  func.func @transform_0(%arg0: i32) -> (i32, i32, i32) {
    %c0_i32 = arith.constant 0 : i32
    %c0_i32_0 = arith.constant 0 : i32
    %c0_i32_1 = arith.constant 0 : i32
    return %arg0, %c0_i32, %c0_i32_0 : i32, i32, i32
  }
  func.func @transform_1(%arg0: i32) -> (i32, i32, i32) {
    %c0_i32 = arith.constant 0 : i32
    %c0_i32_0 = arith.constant 0 : i32
    %c0_i32_1 = arith.constant 0 : i32
    %c0_i32_2 = arith.constant 0 : i32
    return %c0_i32, %c0_i32_0, %c0_i32_1 : i32, i32, i32
  }
  func.func @transform_2(%arg0: i32) -> (i32, i32, i32) {
    %c0_i32 = arith.constant 0 : i32
    %c0_i32_0 = arith.constant 0 : i32
    %c0_i32_1 = arith.constant 0 : i32
    return %arg0, %c0_i32, %c0_i32_0 : i32, i32, i32
  }
  func.func @transform_3(%arg0: i32) -> (i32, i32, i32) {
    %c0_i32 = arith.constant 0 : i32
    %c0_i32_0 = arith.constant 0 : i32
    %c0_i32_1 = arith.constant 0 : i32
    return %arg0, %c0_i32, %c0_i32_0 : i32, i32, i32
  }
}

</mosaic_0001>

<bundles_post_ra>
// kernel: tpu_custom_call.1
= control target key start
LH: loop header
LB: loop body
LE: loop exit
PB: predicated region body
PF: predicated region fallthrough
CT: control target
= control target key end

     0   :  { %vm39_vm0 = vcmask 1040384   ;;  %s169_s0 = inlined_call_operand.vmem [shape: f32[4,1,128], index: 0, kind: input, shape index: {}]   ;;  %s170_s1 = inlined_call_operand.vmem [shape: f32[1,8,128], index: 1, kind: input, shape index: {}]   ;;  %s171_s2 = inlined_call_operand.vmem [shape: f32[4,7,128], index: 2, kind: input, shape index: {}]   ;;  %s172_s3 = inlined_call_operand.hbm [shape: f32[4,16,128], index: 3, kind: output, shape index: {}]  }
   0x1   :  { %v15_v0 = vld [vmem:[%s170_s1] sm:$0xff]  ;;  %v21_v6 = vld [vmem:[%s171_s2 + $0x8] sm:$0x7f]  ;;  %v22_v9 = vld [vmem:[%s171_s2 + $0x10] sm:$0x7f] }
   0x2   :  { %v16_v1 = vld [vmem:[%s169_s0] sm:$0x1]  ;;  %v25_v3 = vrot.slane %v15_v0, 7  ;;  %v17_v5 = vld [vmem:[%s169_s0 + $0x1] sm:$0x1]  ;;  %v32_v7 = vrot.slane %v21_v6, 7 }
   0x3   :  { %v20_v2 = vld [vmem:[%s171_s2] sm:$0x7f]  ;;  %v23_v15 = vld [vmem:[%s171_s2 + $0x18] sm:$0x7f] }
   0x4   :  { %v31_v4 = vrot.slane %v20_v2, 7  ;;  %v18_v8 = vld [vmem:[%s169_s0 + $0x2] sm:$0x1]  ;;  %v40_v10 = vsel %vm39_vm0, %v16_v1, %v25_v3  ;;  %v41_v12 = vsel %vm39_vm0, %v17_v5, %v25_v3  ;;  %v19_v14 = vld [vmem:[%s169_s0 + $0x3] sm:$0x1] }
   0x5   :  { %v42_v13 = vsel %vm39_vm0, %v18_v8, %v25_v3 }
   0x6   :  { %v44_v11 = vsel %vm39_vm0, %v25_v3, %v31_v4 }
   0x7   :  { %8 = vsyncpa [#allocation3], 0  ;;  %48 = vst [vmem:[#allocation2] sm:$0xff] %v40_v10  ;;  %v45_v16 = vsel %vm39_vm0, %v25_v3, %v32_v7  ;;  %v33_v17 = vrot.slane %v22_v9, 7  ;;  %v43_v18 = vsel %vm39_vm0, %v19_v14, %v25_v3  ;;  %v34_v19 = vrot.slane %v23_v15, 7  ;;  %s99_s29 = smov [#allocation2]  }
   0x8   :  { %49 = vst [vmem:[#allocation2 + $0x8] sm:$0xff] %v44_v11  ;;  %50 = vst [vmem:[#allocation2 + $0x10] sm:$0xff] %v41_v12  ;;  %s61_s30 = sshll.u32 %s99_s29, 4  ;;  %s62_s30 = int_to_ptr.vmem [resolvable:$true] %s61_s30 }
   0x9   :  { %52 = vst [vmem:[#allocation2 + $0x20] sm:$0xff] %v42_v13  ;;  %51 = vst [vmem:[#allocation2 + $0x18] sm:$0xff] %v45_v16  ;;  %v46_v20 = vsel %vm39_vm0, %v25_v3, %v33_v17  ;;  %v47_v21 = vsel %vm39_vm0, %v25_v3, %v34_v19  ;;  %s75_s0 = scalar_lea.vmem %s62_s30, 1024  ;;  %p80_p1 = scmp.lt.s32.totalorder %s62_s30, %s62_s30 }
   0xa   :  { %54 = vst [vmem:[#allocation2 + $0x30] sm:$0xff] %v43_v18  ;;  %53 = vst [vmem:[#allocation2 + $0x28] sm:$0xff] %v46_v20  ;;  %p76_p0 = scmp.ne.s32.totalorder %s62_s30, %s75_s0  ;;  %p81_p2 = scmp.lt.s32.totalorder %s75_s0, %s75_s0 }
   0xb   :  { %55 = vst [vmem:[#allocation2 + $0x38] sm:$0xff] %v47_v21 }
   0xc   :  { %p82_p3 = por %p81_p2, %p80_p1 }
   0xe   :  { %p83_p4 = pnand %p82_p3, %p76_p0 }
  0x10   :  { %86 = shalt.err (!%p83_p4)
}
  0x11   :  { %s87_s5 = scalar_lea.hbm %s172_s3, 1024 }
  0x12   :  { %p88_p5 = scmp.ne.s32.totalorder %s172_s3, %s87_s5  ;;  %p91_p6 = scmp.lt.u32.totalorder %s87_s5, %s172_s3 }
  0x14   :  { %p93_p7 = pnand %p91_p6, %p88_p5 }
  0x16   :  { %96 = shalt.err (!%p93_p7)
}
  0x17   :  { %s100_s10 = smov 128   ;;  %s101_s11 = smov 8  }
  0x18   :  { %67 = dma.vmem_to_hbm [thread:$0]  %s62_s30, 1024, %s172_s3, [#allocation3], %s100_s10, %s100_s10, %s101_s11  }
  0x19   :  { %97 = dma.done.wait [#allocation3], 1024  }
  0x1a   :  { %98 = vsyncadd [#allocation3], 4294966272 }
  0x1b   :  { %71 = vsyncpa [#allocation3], 1 }

</bundles_post_ra>
